<compile_context>
chip_gen: v7x
topology: tpu7x:2x2x1
jax: 0.10.0
libtpu: 0.0.40
codegen_flags: <defaults>
</compile_context>

<pallas_src>
import jax
import jax.numpy as jnp
from jax import lax
from jax.experimental import pallas as pl
from jax.experimental.pallas import tpu as pltpu

_IGNORE_INDEX = -100          # torch nn.CrossEntropyLoss default
_VMEM_BUDGET = 12 << 20       # fits v5e's 16 MiB default scoped VMEM with headroom


def _ce_loss_kernel(pred_ref, tgt_ref, out_ref):
    # pred_ref: (bn, C, S0, S1); tgt_ref / out_ref: (bn, S0, S1).
    # C is a leading "plane" axis, so max/sum over classes are plain VPU
    # elementwise ops across planes and every pixel vreg is fully packed.
    preds = pred_ref[...].astype(jnp.float32)            # upcast once (bf16-safe)
    tgt = tgt_ref[...].astype(jnp.int32)                 # widen narrow targets here
    tgt4 = tgt[:, None, :, :]                            # (bn, 1, S0, S1)

    m = jnp.max(preds, axis=1, keepdims=True)            # (bn, 1, S0, S1)
    shifted = preds - m                                   # (bn, C, S0, S1)

    ci = lax.broadcasted_iota(jnp.int32, shifted.shape, 1)
    picked = jnp.sum(jnp.where(ci == tgt4, shifted, 0.0), axis=1)    # (bn, S0, S1)
    lse = jnp.log(jnp.sum(jnp.exp(shifted), axis=1))                 # (bn, S0, S1)

    loss = lse - picked
    loss = jnp.where(tgt == _IGNORE_INDEX, 0.0, loss)    # ignore_index -> loss 0
    out_ref[...] = loss.astype(out_ref.dtype)


def segmentation_loss(predictions, targets):
    """predictions: (N, C, H, W); targets: (N, H, W) int -> (N, H*W) loss."""
    N, C, H, W = predictions.shape
    L = H * W
    p_bytes = jnp.dtype(predictions.dtype).itemsize

    # Keep targets narrow in HBM; only force int32 if wider than 32 bits.
    if jnp.dtype(targets.dtype).itemsize > 4:
        targets = targets.astype(jnp.int32)
    t_bytes = jnp.dtype(targets.dtype).itemsize

    out_dtype = (predictions.dtype
                 if jnp.issubdtype(predictions.dtype, jnp.floating) else jnp.float32)
    o_bytes = jnp.dtype(out_dtype).itemsize

    # Per-pixel VMEM cost: double-buffered pred/tgt/out streams plus in-kernel
    # f32 intermediates (shifted, exp, iota/mask, per-pixel reductions).
    per_pixel = 2 * C * p_bytes + 2 * t_bytes + 2 * o_bytes + 4 * C * 4 + 4 * 4
    pix_target = max(_VMEM_BUDGET // per_pixel, 1024)    # >= one (8,128) pixel tile

    packed = (L % 128 == 0)
    if packed:
        rows = L // 128
        preds4 = predictions.reshape(N, C, rows, 128)    # free reinterpret
        tgts = targets.reshape(N, rows, 128)
        if L >= pix_target:
            bn = 1
            if rows < 8:
                ts = rows                                # full dim (exempt from /8)
            else:
                ts = max(8, min((pix_target // 128) // 8, rows // 8) * 8)
        else:
            ts = rows                                    # whole image per block
            bn = max(1, min(N, pix_target // L))         # batch rows to fill the DMA
        n_pix = pl.cdiv(rows, ts)
        pix_per_block = bn * ts * 128
    else:
        # Ragged spatial size: keep pixels on the lane axis; no host pad/slice.
        preds4 = predictions.reshape(N, C, 1, L)
        tgts = targets.reshape(N, 1, L)
        if L >= pix_target:
            bn = 1
            tl = max(128, (min(pix_target, L) // 128) * 128)   # ragged last block
        else:
            tl = L                                       # full dim (exempt from /128)
            bn = max(1, min(N, pix_target // L))
        n_pix = pl.cdiv(L, tl)
        pix_per_block = bn * tl

    # Keep at least 2 grid steps so v7x's two TensorCores both get work.
    if bn > 1 and pl.cdiv(N, bn) * n_pix < 2:
        bn = max(1, pl.cdiv(N, 2))
        if packed:
            pix_per_block = bn * ts * 128
        else:
            pix_per_block = bn * tl

    if packed:
        in_specs = [
            pl.BlockSpec((bn, C, ts, 128), lambda b, l: (b, 0, l, 0)),
            pl.BlockSpec((bn, ts, 128), lambda b, l: (b, l, 0)),
        ]
        out_spec = pl.BlockSpec((bn, ts, 128), lambda b, l: (b, l, 0))
        out_struct = jax.ShapeDtypeStruct((N, rows, 128), out_dtype)
    else:
        in_specs = [
            pl.BlockSpec((bn, C, 1, tl), lambda b, l: (b, 0, 0, l)),
            pl.BlockSpec((bn, 1, tl), lambda b, l: (b, 0, l)),
        ]
        out_spec = pl.BlockSpec((bn, 1, tl), lambda b, l: (b, 0, l))
        out_struct = jax.ShapeDtypeStruct((N, 1, L), out_dtype)

    grid = (pl.cdiv(N, bn), n_pix)

    compiler_kwargs = dict(dimension_semantics=("parallel", "parallel"))
    est = pix_per_block * per_pixel
    if est > (14 << 20):
        # Only for very large class counts; cap at 48 MiB (v7x has 64 MiB physical).
        compiler_kwargs["vmem_limit_bytes"] = int(
            min(max(est + est // 2, 32 << 20), 48 << 20))

    out = pl.pallas_call(
        _ce_loss_kernel,
        out_shape=out_struct,
        grid_spec=pltpu.PrefetchScalarGridSpec(
            num_scalar_prefetch=0,
            grid=grid,
            in_specs=in_specs,
            out_specs=out_spec,
        ),
        compiler_params=pltpu.CompilerParams(**compiler_kwargs),
    )(preds4, tgts)

    return out.reshape(N, L)


def _reference(predictions, targets):
    N, C, H, W = predictions.shape
    p = predictions.reshape(N, C, H * W).astype(jnp.float32)
    t = targets.reshape(N, H * W).astype(jnp.int32)
    logp = jax.nn.log_softmax(p, axis=1)
    ce = -jnp.take_along_axis(logp, jnp.clip(t, 0, C - 1)[:, None, :], axis=1)[:, 0, :]
    return jnp.where(t == _IGNORE_INDEX, 0.0, ce)


if __name__ == "__main__":
    key = jax.random.PRNGKey(0)
    kp, kt, kp2, kt2 = jax.random.split(key, 4)

    # Case 1: lane-aligned spatial size -> packed (rows, 128) pixel layout,
    # with narrow int8 targets kept narrow all the way into the kernel.
    N, C, H, W = 2, 4, 16, 16
    predictions = jax.random.normal(kp, (N, C, H, W), dtype=jnp.float32)
    targets = jax.random.randint(kt, (N, H, W), 0, C, dtype=jnp.int32).astype(jnp.int8)

    loss = jax.block_until_ready(segmentation_loss(predictions, targets))
    ref = _reference(predictions, targets)
    assert loss.shape == (N, H * W)
    assert jnp.allclose(loss, ref, atol=1e-5, rtol=1e-5), \
        float(jnp.max(jnp.abs(loss - ref)))

    # Case 2: non-lane-multiple spatial size exercises the ragged path
    # (no host-side padding, no output slice).
    N2, C2, H2, W2 = 2, 4, 10, 10
    predictions2 = jax.random.normal(kp2, (N2, C2, H2, W2), dtype=jnp.float32)
    targets2 = jax.random.randint(kt2, (N2, H2, W2), 0, C2, dtype=jnp.int32)

    loss2 = jax.block_until_ready(segmentation_loss(predictions2, targets2))
    ref2 = _reference(predictions2, targets2)
    assert loss2.shape == (N2, H2 * W2)
    assert jnp.allclose(loss2, ref2, atol=1e-5, rtol=1e-5), \
        float(jnp.max(jnp.abs(loss2 - ref2)))

    print("KERNEL_OK")
</pallas_src>

<mosaic_0001>
module attributes {stable_mosaic.version = 11 : i64} {
  func.func @_ce_loss_kernel(%arg0: i32, %arg1: i32, %arg2: memref<1x4x2x128xf32, #tpu.memory_space<vmem>>, %arg3: memref<1x2x128xi8, #tpu.memory_space<vmem>>, %arg4: memref<1x2x128xf32, #tpu.memory_space<vmem>>) attributes {dimension_semantics = [#tpu.dimension_semantics<parallel>, #tpu.dimension_semantics<parallel>], iteration_bounds = array<i64: 2, 1>, scalar_prefetch = 0 : i64, scratch_operands = 0 : i64, tpu.core_type = #tpu.core_type<tc>, window_params = [{transform_indices = @transform_0, window_bounds = array<i64: 1, 4, 2, 128>}, {transform_indices = @transform_1, window_bounds = array<i64: 1, 2, 128>}, {transform_indices = @transform_2, window_bounds = array<i64: 1, 2, 128>}]} {
    %c0 = arith.constant 0 : index
    %c0_0 = arith.constant 0 : index
    %c0_1 = arith.constant 0 : index
    %c0_2 = arith.constant 0 : index
    %0 = vector.load %arg2[%c0, %c0_0, %c0_1, %c0_2] : memref<1x4x2x128xf32, #tpu.memory_space<vmem>>, vector<1x4x2x128xf32>
    %c0_3 = arith.constant 0 : index
    %c0_4 = arith.constant 0 : index
    %c0_5 = arith.constant 0 : index
    %1 = vector.load %arg3[%c0_3, %c0_4, %c0_5] : memref<1x2x128xi8, #tpu.memory_space<vmem>>, vector<1x2x128xi8>
    %2 = arith.extsi %1 : vector<1x2x128xi8> to vector<1x2x128xi32>
    %3 = vector.shape_cast %2 : vector<1x2x128xi32> to vector<1x1x2x128xi32>
    %cst = arith.constant dense<0xFF800000> : vector<1x2x128xf32>
    %4 = vector.multi_reduction <maximumf>, %0, %cst [1] : vector<1x4x2x128xf32> to vector<1x2x128xf32>
    %5 = vector.shape_cast %4 : vector<1x2x128xf32> to vector<1x1x2x128xf32>
    %6 = vector.broadcast %5 : vector<1x1x2x128xf32> to vector<1x4x2x128xf32>
    %7 = arith.subf %0, %6 : vector<1x4x2x128xf32>
    %8 = tpu.iota {dimensions = array<i32: 1>} : vector<1x4x2x128xi32>
    %9 = vector.broadcast %3 : vector<1x1x2x128xi32> to vector<1x4x2x128xi32>
    %10 = arith.cmpi eq, %8, %9 : vector<1x4x2x128xi32>
    %cst_6 = arith.constant 0.000000e+00 : f32
    %11 = vector.broadcast %cst_6 : f32 to vector<1x4x2x128xf32>
    %12 = arith.select %10, %7, %11 : vector<1x4x2x128xi1>, vector<1x4x2x128xf32>
    %cst_7 = arith.constant dense<0.000000e+00> : vector<1x2x128xf32>
    %13 = vector.multi_reduction <add>, %12, %cst_7 [1] : vector<1x4x2x128xf32> to vector<1x2x128xf32>
    %14 = math.exp %7 : vector<1x4x2x128xf32>
    %cst_8 = arith.constant dense<0.000000e+00> : vector<1x2x128xf32>
    %15 = vector.multi_reduction <add>, %14, %cst_8 [1] : vector<1x4x2x128xf32> to vector<1x2x128xf32>
    %16 = math.log %15 : vector<1x2x128xf32>
    %17 = arith.subf %16, %13 : vector<1x2x128xf32>
    %c-100_i32 = arith.constant -100 : i32
    %18 = vector.broadcast %c-100_i32 : i32 to vector<1x2x128xi32>
    %19 = arith.cmpi eq, %2, %18 : vector<1x2x128xi32>
    %cst_9 = arith.constant 0.000000e+00 : f32
    %20 = vector.broadcast %cst_9 : f32 to vector<1x2x128xf32>
    %21 = arith.select %19, %20, %17 : vector<1x2x128xi1>, vector<1x2x128xf32>
    %c0_10 = arith.constant 0 : index
    %c0_11 = arith.constant 0 : index
    %c0_12 = arith.constant 0 : index
    %22 = vector.load %arg4[%c0_10, %c0_11, %c0_12] : memref<1x2x128xf32, #tpu.memory_space<vmem>>, vector<1x2x128xf32>
    tpu.vector_store %arg4[%c0_10, %c0_11, %c0_12], %21 {strides = array<i32>} : memref<1x2x128xf32, #tpu.memory_space<vmem>>, vector<1x2x128xf32>,
    return
  }
  func.func @transform_0(%arg0: i32, %arg1: i32) -> (i32, i32, i32, i32) {
    %c0_i32 = arith.constant 0 : i32
    %c0_i32_0 = arith.constant 0 : i32
    %c0_i32_1 = arith.constant 0 : i32
    return %arg0, %c0_i32, %arg1, %c0_i32_0 : i32, i32, i32, i32
  }
  func.func @transform_1(%arg0: i32, %arg1: i32) -> (i32, i32, i32) {
    %c0_i32 = arith.constant 0 : i32
    %c0_i32_0 = arith.constant 0 : i32
    return %arg0, %arg1, %c0_i32 : i32, i32, i32
  }
  func.func @transform_2(%arg0: i32, %arg1: i32) -> (i32, i32, i32) {
    %c0_i32 = arith.constant 0 : i32
    %c0_i32_0 = arith.constant 0 : i32
    return %arg0, %arg1, %c0_i32 : i32, i32, i32
  }
}

</mosaic_0001>

<bundles_post_ra>
// kernel: tpu_custom_call.1
= control target key start
LH: loop header
LB: loop body
LE: loop exit
PB: predicated region body
PF: predicated region fallthrough
CT: control target
= control target key end

     0   :  { %7 = vsyncpa [#allocation3], 0  ;;  %s779_s0 = inlined_call_operand.hbm [shape: f32[2,4,2,128], index: 0, kind: input, shape index: {}]   ;;  %s780_s1 = inlined_call_operand.vmem [shape: s8[2,2,128], index: 1, kind: input, shape index: {}]   ;;  %s781_s2 = inlined_call_operand.hbm [shape: f32[2,2,128], index: 2, kind: output, shape index: {}]  }
   0x1   :  { %9 = vsyncpa [#allocation3 + $0x1], 0 }
   0x2   :  { %10 = vsyncpa [#allocation4], 0 }
   0x3   :  { %12 = vsyncpa [#allocation4 + $0x1], 0  ;;  %s588_s9 = smov 0   ;;  %s590_s10 = smov 0  }
   0x4   :  { %s592_s11 = smov 0   ;;  %s594_s12 = smov 0  }
   0x5   :  { %s596_s13 = smov 0   ;;  %s598_s14 = smov 0  }
   0x6 LB: > { %s366_s15 = sadd.s32 4294967295, %s567_s14   ;;  %s367_s16 = sadd.s32 4294967294, %s567_s14   ;;  %s567_s14 = sphi %s598_s14, %s18_s14   ;;  %s563_s13 = sphi %s596_s13, %s796_s13   ;;  %s559_s12 = sphi %s594_s12, %s795_s12   ;;  %s555_s11 = sphi %s592_s11, %s794_s11   ;;  %s551_s10 = sphi %s590_s10, %s793_s10   ;;  %s547_s9 = sphi %s588_s9, %s792_s9  }
   0x7   : > { %s30_s17 = sadd.s32 1, %s563_s13  ;;  %s39_s18 = sadd.s32 1, %s555_s11 }
   0x8   : > { %p32_p0 = scmp.ge.s32.totalorder %s30_s17, 2  ;;  %p46_p1 = scmp.ne.s32.totalorder %s555_s11, %s551_s10 }
   0x9   : > { %p47_p2 = scmp.eq.s32.totalorder %s567_s14, 0  ;;  %p52_p3 = scmp.ne.s32.totalorder %s551_s10, %s547_s9 }
   0xa   : > { %s798_s17 = smov (%p32_p0, %s30_s17), 0  ;;  %p53_p5 = scmp.eq.s32.totalorder %s366_s15, 0 }
   0xb   : > { %p629_p4 = por %p47_p2, %p46_p1  ;;  %s34_s20 = ssub.s32 %s563_s13, %s798_s17 }
   0xc   : > { %p106_p6 = scmp.eq.s32.totalorder %s366_s15, 1  ;;  %p37_p7 = scmp.eq.s32.totalorder %s34_s20, 0 }
   0xd   : > { %p635_p8 = por %p53_p5, %p52_p3  ;;  %p112_p10 = scmp.eq.s32.totalorder %s367_s16, 1 }
   0xe   : > { %p639_p9 = por %p106_p6, %p46_p1  ;;  %p393_p13 = scmp.lt.s32.totalorder %s567_s14, 2 }
   0xf   : > { %s644_s23 = scalar_select %p37_p7, %s555_s11, %s39_s18  }
  0x10   : > { %s785_s22 = scalar_select %p639_p9, 1, 0 }
  0x11   : > { %p646_p11 = por %p112_p10, %p52_p3  ;;  %s132_s25 = sand.u32 1, %s555_s11  }
  0x12   : > { %s370_s26 = sshll.u32 %s132_s25, 3  ;;  %s380_s27 = sshll.u32 %s563_s13, 7 }
  0x13   : > { %s786_s24 = scalar_select %p646_p11, 1, 0 }
  0x14   : > { %s657_s30 = scalar_lea.hbm %s779_s0, %s380_s27  ;;  %s136_s3 = scalar_lea.vmem [#allocation2], %s370_s26 }
  0x15   : > { %s144_s4 = sshll.u32 %s136_s3, 4  ;;  %p663_p0 = pnand %p393_p13, %p629_p4  ;;  %s659_s4 = int_to_ptr.vmem [resolvable:$true] %s144_s4 }
  0x16   : > { %s668_s6 = scalar_lea.sflag [#allocation3], %s132_s25  ;;  %s455_s7 = scalar_lea.hbm %s657_s30, 128 }
  0x17   : > { %p456_p2 = scmp.ne.s32.totalorder %s657_s30, %s455_s7  ;;  %p457_p3 = pneg %p663_p0 }
  0x18   : > { %s460_s16 = scalar_lea.hbm %s779_s0, 256  ;;  %p461_p4 = scmp.lt.u32.totalorder %s657_s30, %s779_s0 }
  0x19   : > { %p458_p5 = pnand %p457_p3, %p456_p2  ;;  %p462_p7 = scmp.lt.u32.totalorder %s460_s16, %s455_s7 }
  0x1a   : > { %p464_p13 = scmp.lt.u32.totalorder %s455_s7, %s657_s30 }
  0x1b   : > { %p459_p6 = pneg %p458_p5  ;;  %p463_p10 = por %p462_p7, %p461_p4 }
  0x1d   : > { %p465_p12 = por %p464_p13, %p463_p10 }
  0x1f   : > { %p466_p1 = pnand %p465_p12, %p459_p6 }
  0x21   : > { %469 = shalt.err (!%p466_p1)
}
  0x22   : > { %s470_s20 = scalar_lea.vmem %s659_s4, 128  ;;  %s569_s25 = smov [#allocation2]  }
  0x23   : > { %p471_p2 = scmp.ne.s32.totalorder %s659_s4, %s470_s20  ;;  %s475_s26 = sshll.u32 %s569_s25, 4  ;;  %s476_s26 = int_to_ptr.vmem [resolvable:$false] %s475_s26 }
  0x24   : > { %s477_s27 = scalar_lea.vmem %s476_s26, 256  ;;  %p478_p9 = scmp.lt.s32.totalorder %s659_s4, %s476_s26 }
  0x25   : > { %p473_p5 = pnand %p471_p2, %p457_p3  ;;  %p479_p4 = scmp.lt.s32.totalorder %s477_s27, %s470_s20 }
  0x27   : > { %p474_p11 = pneg %p473_p5  ;;  %p480_p7 = por %p479_p4, %p478_p9 }
  0x29   : > { %p481_p10 = pnand %p480_p7, %p474_p11 }
  0x2b   : > { %484 = shalt.err (!%p481_p10)
}
  0x2c   : > { %s570_s28 = smov 32   ;;  %s571_s29 = smov 2  }
  0x2d   : > { %388 = dma.hbm_to_vmem [thread:$0]  (!%p663_p0), %s657_s30, 128, %s659_s4, %s668_s6, %s570_s28, %s570_s28, %s571_s29  }
  0x2e   : > { %p161_p12 = scmp.lt.s32.totalorder %s567_s14, 3  ;;  %p788_p1 = scmp.ge.s32.totalorder %s567_s14, 1 }
  0x30   : > { %p162_p3 = pnand %p788_p1, %p161_p12 }
  0x31   : > { %s700_s3 = sand.u32 (!%p162_p3), 1, %s551_s10  }
  0x32   : > { %165 = sbr.rel (%p162_p3) target bundleno = 118 (0x76), region = 28  ;;  %s374_s7 = sshll.u32 (!%p162_p3), %s700_s3, 3 }
  0x33   : > { %s168_s8 = scalar_lea.sflag (!%p162_p3), [#allocation3], %s700_s3  ;;  %s171_s15 = scalar_lea.vmem (!%p162_p3), [#allocation2], %s374_s7 }
  0x39   : > { %538 = dma.done.wait (%p635_p8), %s168_s8, 128  }
  0x3a   : > { %540 = vsyncadd (%p635_p8), %s168_s8, 4294967168  ;;  %vm210_vm0 = vcmask 1041408   ;;  %v204_v0 = vld [vmem:[%s171_s15] sm:$0x3]  ;;  %v205_v1 = vld [vmem:[%s171_s15 + $0x2] sm:$0x3] }
  0x3b   : > { %v206_v2 = vld [vmem:[%s171_s15 + $0x4] sm:$0x3]  ;;  %v207_v3 = vld [vmem:[%s171_s15 + $0x6] sm:$0x3]  ;;  %v211_v4 = vsel %vm210_vm0, %v204_v0, -inf  ;;  %v212_v5 = vsel %vm210_vm0, %v205_v1, -inf }
  0x3c   : > { %v213_v6 = vsel %vm210_vm0, %v206_v2, -inf  ;;  %v214_v7 = vsel %vm210_vm0, %v207_v3, -inf  ;;  %v215_v8 = vmax.f32 %v211_v4, %v212_v5  ;;  %p198_p9 = scmp.lt.s32.totalorder %s559_s12, 1  ;;  %s375_s6 = sshll.u32 %s700_s3, 1 }
  0x3d   : > { %v216_v9 = vmax.f32 %v213_v6, %v214_v7  ;;  %s197_s16 = scalar_lea.vmem [#allocation5], %s375_s6  ;;  %s377_s19 = sshll.u32 %s559_s12, 5 }
  0x3e   : > { %s199_s21 = scalar_select %p198_p9, %s559_s12, 1 }
  0x3f   : > { %v217_v10 = vmax.f32 %v215_v8, %v216_v9  ;;  %s273_s18 = sshll.u32 %s197_s16, 4  ;;  %s732_s26 = scalar_lea.hbm %s781_s2, %s377_s19  ;;  %s727_s18 = int_to_ptr.vmem [resolvable:$true] %s273_s18 }
  0x40   : > { %s203_s5 = scalar_lea.vmem %s780_s1, %s199_s21  ;;  %s259_s27 = scalar_lea.sflag [#allocation4], %s700_s3 }
  0x41   : > { %v218_v11 = vsub.f32 %v204_v0, %v217_v10  ;;  %v219_v12 = vsub.f32 %v205_v1, %v217_v10  ;;  %v220_v13 = vsub.f32 %v206_v2, %v217_v10  ;;  %v221_v14 = vsub.f32 %v207_v3, %v217_v10  ;;  %v208_v19 = vld [vmem:[%s203_s5] sm:$0x1]  ;;  %s485_s28 = scalar_lea.vmem %s727_s18, 32  ;;  %p789_p11 = scmp.ne.s32.totalorder %s785_s22, 0 }
  0x42   : > { %v209_v20 = vunpack.c.0.s8 %v208_v19  ;;  %p486_p8 = scmp.ne.s32.totalorder %s727_s18, %s485_s28  ;;  %s572_s12 = smov [#allocation5]  }
  0x43   : > { %v237_v15 = vmul.f32 1.442695, %v218_v11  ;;  %v239_v16 = vmul.f32 1.442695, %v219_v12  ;;  %v241_v17 = vmul.f32 1.442695, %v220_v13 }
  0x44   : > { %v243_v18 = vmul.f32 1.442695, %v221_v14  ;;  %vm222_vm1 = vcmp.eq.s32.totalorder %v209_v20, 0  ;;  %vm223_vm2 = vcmp.eq.s32.totalorder %v209_v20, 1  ;;  %vm224_vm3 = vcmp.eq.s32.totalorder %v209_v20, 2  ;;  %p487_p0 = pnand %p486_p8, %p789_p11  ;;  %s489_s29 = sshll.u32 %s572_s12, 4  ;;  %s490_s29 = int_to_ptr.vmem [resolvable:$false] %s489_s29 }
  0x45   : > { %445 = vpow2.f32 %v237_v15  ;;  %v226_v29 = vsel %vm222_vm1, %v218_v11, 0.0  ;;  %v227_v30 = vsel %vm223_vm2, %v219_v12, 0.0  ;;  %v228_v36 = vsel %vm224_vm3, %v220_v13, 0.0  ;;  %s491_s7 = scalar_lea.vmem %s490_s29, 64  ;;  %p492_p13 = scmp.lt.s32.totalorder %s727_s18, %s490_s29 }
  0x46   : > { %447 = vpow2.f32 %v239_v16  ;;  %v230_v33 = vsel %vm210_vm0, %v226_v29, 0.0  ;;  %v231_v34 = vsel %vm210_vm0, %v227_v30, 0.0  ;;  %vm225_vm4 = vcmp.eq.s32.totalorder %v209_v20, 3  ;;  %p488_p6 = pneg %p487_p0  ;;  %p493_p2 = scmp.lt.s32.totalorder %s491_s7, %s485_s28 }
  0x47   : > { %449 = vpow2.f32 %v241_v17  ;;  %v232_v37 = vadd.f32 %v231_v34, %v230_v33  ;;  %v233_v38 = vsel %vm210_vm0, %v228_v36, 0.0  ;;  %v229_v39 = vsel %vm225_vm4, %v221_v14, 0.0 }
  0x48   : > { %451 = vpow2.f32 %v243_v18  ;;  %v235_v41 = vsel %vm210_vm0, %v229_v39, 0.0  ;;  %vm255_vm5 = vcmp.eq.s32.totalorder %v209_v20, 4294967196  ;;  %p494_p5 = por %p493_p2, %p492_p13 }
  0x49   : > { %v234_v40 = vadd.f32 %v233_v38, %v232_v37 }
  0x4a   : > { %p495_p4 = pnand %p494_p5, %p488_p6 }
  0x4b   : > { %v236_v42 = vadd.f32 %v235_v41, %v234_v40 }
  0x4f   : > { %v446_v21 = vpop.eup %445 }
  0x50   : > { %v448_v22 = vpop.eup %447  ;;  %v245_v23 = vsel %vm210_vm0, %v446_v21, 0.0 }
  0x51   : > { %v450_v24 = vpop.eup %449  ;;  %v246_v25 = vsel %vm210_vm0, %v448_v22, 0.0 }
  0x52   : > { %v452_v26 = vpop.eup %451  ;;  %v247_v27 = vadd.f32 %v246_v25, %v245_v23  ;;  %v248_v28 = vsel %vm210_vm0, %v450_v24, 0.0 }
  0x53   : > { %v250_v31 = vsel %vm210_vm0, %v452_v26, 0.0 }
  0x54   : > { %v249_v32 = vadd.f32 %v248_v28, %v247_v27 }
  0x56   : > { %v251_v35 = vadd.f32 %v250_v31, %v249_v32 }
  0x58   : > { %453 = vlog2.f32 %v251_v35 }
  0x62   : > { %v454_v43 = vpop.eup %453 }
  0x63   : > { %v253_v44 = vmul.f32 0.6931472, %v454_v43 }
  0x65   : > { %v254_v45 = vsub.f32 %v253_v44, %v236_v42 }
  0x67   : > { %v256_v46 = vsel %vm255_vm5, 0.0, %v254_v45 }
  0x68   : > { %257 = vst [vmem:[%s197_s16] sm:$0x3] %v256_v46 }
  0x69   : > { %498 = shalt.err (!%p495_p4)
}
  0x6a   : > { %s499_s3 = scalar_lea.hbm %s732_s26, 32  ;;  %s503_s21 = scalar_lea.hbm %s781_s2, 64 }
  0x6b   : > { %p500_p7 = scmp.ne.s32.totalorder %s732_s26, %s499_s3  ;;  %p504_p1 = scmp.lt.u32.totalorder %s732_s26, %s781_s2 }
  0x6c   : > { %p505_p3 = scmp.lt.u32.totalorder %s503_s21, %s499_s3  ;;  %p507_p8 = scmp.lt.u32.totalorder %s499_s3, %s732_s26 }
  0x6d   : > { %p501_p10 = pnand %p500_p7, %p789_p11 }
  0x6e   : > { %p506_p9 = por %p505_p3, %p504_p1 }
  0x6f   : > { %p502_p12 = pneg %p501_p10 }
  0x70   : > { %p508_p0 = por %p507_p8, %p506_p9 }
  0x72   : > { %p509_p6 = pnand %p508_p0, %p502_p12 }
  0x74   : > { %512 = shalt.err (!%p509_p6)
}
  0x75   : > { %383 = dma.vmem_to_hbm [thread:$0]  (%p789_p11), %s727_s18, 32, %s732_s26, %s259_s27  }
  0x76 PF: > { %s285_s5 = sand.u32 1, %s547_s9   ;;  %p790_p13 = scmp.ne.s32.totalorder %s786_s24, 0 }
  0x77   : > { %p791_p2 = scmp.ge.s32.totalorder %s567_s14, 2  ;;  %s286_s6 = scalar_lea.sflag [#allocation4], %s285_s5 }
  0x79   : > { %p390_p5 = pnand %p791_p2, %p790_p13 }
  0x7b   : > { %542 = dma.done.wait (!%p390_p5), %s286_s6, 32  }
  0x7c   : > { %544 = vsyncadd (!%p390_p5), %s286_s6, 4294967264  ;;  %s18_s14 = sadd.s32 1, %s567_s14   ;;  %s792_s9 = smov %s551_s10 }
  0x7d   : > { %p15_p4 = scmp.ge.s32.totalorder %s18_s14, 4   ;;  %s793_s10 = smov %s555_s11 }
  0x7e   : > { %s794_s11 = smov %s644_s23  ;;  %s795_s12 = smov %s563_s13 }
  0x7f   : > { %s796_s13 = smov %s798_s17  ;;  %17 = sbr.rel (!%p15_p4) target bundleno = 6 (0x6), region = 76 }
  0x86   :  { %291 = vsyncpa [#allocation3], 1 }
  0x87   :  { %293 = vsyncpa [#allocation3 + $0x1], 1 }
  0x88   :  { %294 = vsyncpa [#allocation4], 1 }
  0x89   :  { %296 = vsyncpa [#allocation4 + $0x1], 1 }

</bundles_post_ra>
